<compile_context>
chip_gen: v7x
topology: tpu7x:2x2x1
jax: 0.10.0
libtpu: 0.0.40
codegen_flags: <defaults>
</compile_context>

<pallas_src>
import functools
import math

import jax
import jax.numpy as jnp
import numpy as np
from jax.experimental import pallas as pl
from jax.experimental.pallas import tpu as pltpu

_LANE = 128     # vreg lane width (fast axis)
_SUBLANE = 8    # vreg sublane count (slow axis)


def build_pe(d_model: int, max_seq_len: int = 160) -> jnp.ndarray:
    """Replicates the PyTorch __init__ buffer exactly (incl. index -1 wrap)."""
    pe = np.zeros((max_seq_len, d_model), dtype=np.float32)
    for pos in range(max_seq_len):
        for i in range(0, d_model, 2):
            pe[pos, (i - 1) % d_model] = math.sin(pos / 10000 ** (2 * i / d_model))
            pe[pos, i] = math.cos(pos / 10000 ** (2 * (i + 1) / d_model))
    return jnp.asarray(pe)  # (max_seq_len, d_model) float32


def _pos_enc_kernel(x_ref, pe_ref, o_ref, *, scale):
    # x_ref: (tile_rows, tile_c); pe_ref: (1, tile_c) or (tile_rows, tile_c).
    x = x_ref[...].astype(jnp.float32)
    p = pe_ref[...].astype(jnp.float32)          # broadcasts over sublanes if 1 row
    o_ref[...] = (x * scale + p).astype(o_ref.dtype)


def _vmem_caps():
    """Generation-aware (working-set budget, cap for vmem_limit_bytes)."""
    cap = 64 * 1024 * 1024  # conservative default = v7x physical VMEM per TC
    try:
        info = pltpu.get_tpu_info()
        cap = int(getattr(info, "vmem_capacity_bytes", cap)) or cap
    except Exception:
        pass
    budget = min(cap // 3, 42 * 1024 * 1024)            # ~21 MiB v7x, 42 MiB v5e/v6e
    limit_cap = min((3 * cap) // 4, 64 * 1024 * 1024)   # 48 MiB v7x, 64 MiB v5e/v6e
    return budget, limit_cap


def positional_encoder(
    x: jnp.ndarray,
    pe: jnp.ndarray,
    d_model: int,
    *,
    vmem_budget_bytes: int | None = None,
) -> jnp.ndarray:
    """x: (B, S, D), pe: (max_seq_len, D) float32 -> (B, S, D) of x.dtype."""
    B, S, D = x.shape
    if D != d_model:
        raise ValueError(f"d_model mismatch: x has D={D}, expected {d_model}")
    if pe.shape[-1] != d_model:
        raise ValueError(f"pe has d_model={pe.shape[-1]}, expected {d_model}")
    if S > pe.shape[0]:
        raise ValueError(f"seq_len {S} exceeds max_seq_len {pe.shape[0]}")

    budget, limit_cap = _vmem_caps()
    if vmem_budget_bytes is not None:
        budget = int(vmem_budget_bytes)

    x_bytes = jnp.dtype(x.dtype).itemsize

    # ---- layout: rows = B*S1, cols = (S // S1) * D -------------------------
    if B < _SUBLANE and S % _SUBLANE == 0 and D % _LANE == 0:
        S1 = S                      # fold sequence into sublanes: (B*S, D)
    else:
        S1 = 1                      # flatten (S, D) into lanes:   (B, S*D)
    rows, C = B * S1, (S // S1) * D

    x2 = x.reshape(rows, C)
    pe2 = pe[:S, :].reshape(S1, C)
    if jnp.issubdtype(x.dtype, jnp.floating) and x_bytes < 4:
        pe2 = pe2.astype(x.dtype)   # halve pe traffic for bf16/f16 inputs
    pe_bytes = jnp.dtype(pe2.dtype).itemsize

    total_bytes = 2 * rows * C * x_bytes + S1 * C * pe_bytes
    large = total_bytes > 4 * 1024 * 1024

    # ---- row tile ----------------------------------------------------------
    if S1 == 1:
        tile_rows = rows if rows <= 256 else 256          # multiple of 8 when tiled
    else:
        # Largest multiple-of-8 divisor of S whose full-width tile fits the
        # budget and (for large problems) still leaves >= 4 grid steps.
        tile_rows = _SUBLANE
        for tr in sorted((d for d in range(_SUBLANE, S + 1)
                          if S % d == 0 and d % _SUBLANE == 0), reverse=True):
            fits = 2 * (2 * tr * x_bytes + tr * pe_bytes) * C <= budget
            steps_ok = (not large) or (rows // tr) >= 4
            if fits and steps_ok:
                tile_rows = tr
                break
    row_blocks = pl.cdiv(rows, tile_rows)
    pe_rows = 1 if S1 == 1 else tile_rows
    pe_row_blocks = S1 // pe_rows   # 1 in the broadcast layout

    # ---- column tile (lane-dense multiple of 128, budget-derived) ----------
    bytes_per_col = 2 * (2 * tile_rows * x_bytes + pe_rows * pe_bytes)  # dbl-buffered
    if C % _LANE != 0 or C <= _LANE:
        tile_c = C                  # only legal block width
    else:
        tile_c = max(_LANE, (budget // (bytes_per_col * _LANE)) * _LANE)
        tile_c = min(tile_c, C)
        if large:
            # Keep >= 4 total grid steps so the software pipeline streams and
            # both v7x TensorCores get work.
            min_col_blocks = pl.cdiv(4, row_blocks)
            if pl.cdiv(C, tile_c) < min_col_blocks:
                tile_c = max(_LANE, (C // min_col_blocks) // _LANE * _LANE)
    col_blocks = pl.cdiv(C, tile_c)

    needed_vmem = bytes_per_col * tile_c
    vmem_limit = int(min(max(2 * needed_vmem, 16 * 1024 * 1024), limit_cap))

    # ---- specs: lane axis outer, rows inner (pe tile reused across rows) ---
    x_spec = pl.BlockSpec((tile_rows, tile_c), lambda c, r: (r, c))
    if pe_row_blocks == 1:
        pe_spec = pl.BlockSpec((pe_rows, tile_c), lambda c, r: (0, c))
    else:
        pe_spec = pl.BlockSpec((pe_rows, tile_c),
                               lambda c, r: (r % pe_row_blocks, c))

    kernel = functools.partial(_pos_enc_kernel, scale=math.sqrt(d_model))
    cost = pl.CostEstimate(
        flops=2 * B * S * D,
        transcendentals=0,
        bytes_accessed=2 * B * S * D * x_bytes + S * D * pe_bytes,
    )

    out2 = pl.pallas_call(
        kernel,
        out_shape=jax.ShapeDtypeStruct((rows, C), x.dtype),
        grid=(col_blocks, row_blocks),
        in_specs=[x_spec, pe_spec],
        out_specs=pl.BlockSpec((tile_rows, tile_c), lambda c, r: (r, c)),
        compiler_params=pltpu.CompilerParams(
            dimension_semantics=("parallel", "parallel"),
            vmem_limit_bytes=vmem_limit,
        ),
        cost_estimate=cost,
    )(x2, pe2)

    return out2.reshape(B, S, D)


if __name__ == "__main__":
    MAX_SEQ_LEN = 160
    key = jax.random.PRNGKey(0)

    def check(B, S, D, budget=None):
        pe = build_pe(D, MAX_SEQ_LEN)
        kx = jax.random.fold_in(key, B * 1_000_000 + S * 1_000 + D)
        x = jax.random.normal(kx, (B, S, D), dtype=jnp.float32)
        out = jax.block_until_ready(
            positional_encoder(x, pe, D, vmem_budget_bytes=budget))
        ref = x * math.sqrt(D) + pe[:S, :][None, :, :]
        np.testing.assert_allclose(np.asarray(out), np.asarray(ref),
                                   rtol=1e-6, atol=1e-6)

    # Primary small case implied by the module's forward: (batch, seq, d_model).
    check(2, 8, 32)
    # Small-batch layout: sequence folded into sublanes, multi-row-block grid.
    check(2, 16, 128)
    # Small-batch layout exercising the pe modulo index_map (tile_rows < S).
    check(2, 32, 128, budget=32 * 1024)
    # Batched layout with several lane-dense column tiles (incl. a partial one).
    check(16, 20, 96, budget=160 * 1024)

    print("KERNEL_OK")
</pallas_src>

<mosaic_0001>
module attributes {stable_mosaic.version = 11 : i64} {
  func.func @_pos_enc_kernel(%arg0: i32, %arg1: i32, %arg2: memref<2x256xf32, #tpu.memory_space<vmem>>, %arg3: memref<1x256xf32, #tpu.memory_space<vmem>>, %arg4: memref<2x256xf32, #tpu.memory_space<vmem>>) attributes {dimension_semantics = [#tpu.dimension_semantics<parallel>, #tpu.dimension_semantics<parallel>], iteration_bounds = array<i64: 1, 1>, scalar_prefetch = 0 : i64, scratch_operands = 0 : i64, tpu.core_type = #tpu.core_type<tc>, window_params = [{transform_indices = @transform_0, window_bounds = array<i64: 2, 256>}, {transform_indices = @transform_1, window_bounds = array<i64: 1, 256>}, {transform_indices = @transform_2, window_bounds = array<i64: 2, 256>}]} {
    %c0 = arith.constant 0 : index
    %c0_0 = arith.constant 0 : index
    %0 = vector.load %arg2[%c0, %c0_0] : memref<2x256xf32, #tpu.memory_space<vmem>>, vector<2x256xf32>
    %c0_1 = arith.constant 0 : index
    %c0_2 = arith.constant 0 : index
    %1 = vector.load %arg3[%c0_1, %c0_2] : memref<1x256xf32, #tpu.memory_space<vmem>>, vector<1x256xf32>
    %cst = arith.constant 5.65685415 : f32
    %2 = vector.broadcast %cst : f32 to vector<2x256xf32>
    %3 = arith.mulf %0, %2 : vector<2x256xf32>
    %4 = vector.broadcast %1 : vector<1x256xf32> to vector<2x256xf32>
    %5 = arith.addf %3, %4 : vector<2x256xf32>
    %c0_3 = arith.constant 0 : index
    %c0_4 = arith.constant 0 : index
    %6 = vector.load %arg4[%c0_3, %c0_4] : memref<2x256xf32, #tpu.memory_space<vmem>>, vector<2x256xf32>
    tpu.vector_store %arg4[%c0_3, %c0_4], %5 {strides = array<i32>} : memref<2x256xf32, #tpu.memory_space<vmem>>, vector<2x256xf32>,
    return
  }
  func.func @transform_0(%arg0: i32, %arg1: i32) -> (i32, i32) {
    %c0_i32 = arith.constant 0 : i32
    return %arg1, %arg0 : i32, i32
  }
  func.func @transform_1(%arg0: i32, %arg1: i32) -> (i32, i32) {
    %c0_i32 = arith.constant 0 : i32
    %c0_i32_0 = arith.constant 0 : i32
    return %c0_i32, %arg0 : i32, i32
  }
  func.func @transform_2(%arg0: i32, %arg1: i32) -> (i32, i32) {
    %c0_i32 = arith.constant 0 : i32
    return %arg1, %arg0 : i32, i32
  }
}

</mosaic_0001>

<bundles_post_ra>
// kernel: tpu_custom_call.1
= control target key start
LH: loop header
LB: loop body
LE: loop exit
PB: predicated region body
PF: predicated region fallthrough
CT: control target
= control target key end

     0   :  { %7 = vsyncpa [#allocation3], 0  ;;  %s158_s0 = inlined_call_operand.hbm [shape: f32[2,256], index: 0, kind: input, shape index: {}]   ;;  %s159_s1 = inlined_call_operand.vmem [shape: f32[1,256], index: 1, kind: input, shape index: {}]   ;;  %s160_s2 = inlined_call_operand.hbm [shape: f32[2,256], index: 2, kind: output, shape index: {}]  }
   0x1   :  { %8 = vsyncpa [#allocation4], 0  ;;  %s113_s9 = smov [#allocation2]   ;;  %s65_s13 = scalar_lea.hbm %s158_s0, 64 }
   0x2   :  { %s15_s10 = sshll.u32 %s113_s9, 4  ;;  %p66_p0 = scmp.ne.s32.totalorder %s158_s0, %s65_s13  ;;  %s16_s10 = int_to_ptr.vmem [resolvable:$true] %s15_s10 }
   0x3   :  { %p69_p1 = scmp.lt.u32.totalorder %s65_s13, %s158_s0 }
   0x5   :  { %p71_p2 = pnand %p69_p1, %p66_p0 }
   0x7   :  { %74 = shalt.err (!%p71_p2)
}
   0x8   :  { %s75_s18 = scalar_lea.vmem %s16_s10, 64  ;;  %p80_p4 = scmp.lt.s32.totalorder %s16_s10, %s16_s10 }
   0x9   :  { %p76_p3 = scmp.ne.s32.totalorder %s16_s10, %s75_s18  ;;  %p81_p5 = scmp.lt.s32.totalorder %s75_s18, %s75_s18 }
   0xb   :  { %p82_p6 = por %p81_p5, %p80_p4 }
   0xd   :  { %p83_p7 = pnand %p82_p6, %p76_p3 }
   0xf   :  { %86 = shalt.err (!%p83_p7)
}
  0x10   :  { %18 = dma.hbm_to_vmem [thread:$0]  %s158_s0, 64, %s16_s10, [#allocation3]  }
  0x11   :  { %109 = dma.done.wait [#allocation3], 64  }
  0x12   :  { %110 = vsyncadd [#allocation3], 4294967232  ;;  %v28_v0 = vlaneseq  ;;  %v114_v1 = vmov 1983009808   ;;  %v24_v7 = vld [vmem:[#allocation2] sm:$0xf] }
  0x13   :  { %v38_v2 = vunpack.c.l.s4 %v114_v1  ;;  %v25_v8 = vld [vmem:[%s159_s1] sm:$0x3]  ;;  %v26_v12 = vmul.f32 5.656854, %v24_v7  ;;  %s115_s0 = smov [#allocation5]  }
  0x14   :  { %v29_v3 = vshrl.u32 %v28_v0, 7  ;;  %s53_s23 = sshll.u32 %s115_s0, 4  ;;  %s54_s23 = int_to_ptr.vmem [resolvable:$true] %s53_s23 }
  0x15   :  { %v39_v6 = vunpack.c.0.s8 %v38_v2  ;;  %s87_s24 = scalar_lea.vmem %s54_s23, 64  ;;  %p92_p9 = scmp.lt.s32.totalorder %s54_s23, %s54_s23 }
  0x16   :  { %v30_v4 = vsub.s32 0, %v29_v3  ;;  %v34_v5 = vsub.s32 1, %v29_v3  ;;  %p88_p8 = scmp.ne.s32.totalorder %s54_s23, %s87_s24  ;;  %p93_p10 = scmp.lt.s32.totalorder %s87_s24, %s87_s24 }
  0x17   :  { %v42_v11 = vsub.s32 %v39_v6, %v29_v3 }
  0x18   :  { %v31_v9 = vrot.slane %v25_v8, %v30_v4  ;;  %v35_v10 = vrot.slane %v25_v8, %v34_v5  ;;  %p94_p11 = por %p93_p10, %p92_p9 }
  0x1a   :  { %v36_v13 = vcombine.low %v31_v9, %v35_v10  ;;  %p95_p12 = pnand %p94_p11, %p88_p8 }
  0x1c   :  { %v43_v14 = vrot.slane %v36_v13, %v42_v11 }
  0x1e   :  { %v45_v15 = vadd.f32 %v43_v14, %v26_v12 }
  0x20   :  { %46 = vst [vmem:[#allocation5] sm:$0xf] %v45_v15 }
  0x21   :  { %98 = shalt.err (!%p95_p12)
}
  0x22   :  { %s99_s26 = scalar_lea.hbm %s160_s2, 64 }
  0x23   :  { %p100_p13 = scmp.ne.s32.totalorder %s160_s2, %s99_s26  ;;  %p103_p0 = scmp.lt.u32.totalorder %s99_s26, %s160_s2 }
  0x25   :  { %p105_p1 = pnand %p103_p0, %p100_p13 }
  0x27   :  { %108 = shalt.err (!%p105_p1)
}
  0x28   :  { %56 = dma.vmem_to_hbm [thread:$0]  %s54_s23, 64, %s160_s2, [#allocation4]  }
  0x29   :  { %111 = dma.done.wait [#allocation4], 64  }
  0x2a   :  { %112 = vsyncadd [#allocation4], 4294967232 }
  0x2b   :  { %60 = vsyncpa [#allocation3], 1 }
  0x2c   :  { %61 = vsyncpa [#allocation4], 1 }

</bundles_post_ra>
